<compile_context>
chip_gen: v6e
topology: v6e:2x2x1
jax: 0.10.0
libtpu: 0.0.40
codegen_flags: <defaults>
</compile_context>

<pallas_src>
import math

import jax
import jax.numpy as jnp
from jax import lax
from jax.experimental import pallas as pl
from jax.experimental.pallas import tpu as pltpu

_LN_EPS = 1e-5   # torch.nn.LayerNorm default eps


# --------------------------------------------------------------------------------------
# Generation-aware row tiling
# --------------------------------------------------------------------------------------
def _num_row_tiles():
    # v7x has 2 TensorCores per chip -> two balanced row tiles on the "parallel" axis.
    # v5e / v6e have a single TensorCore -> one full-extent tile (zero padded rows).
    try:
        kind = jax.devices()[0].device_kind.lower()
    except Exception:
        return 1
    return 2 if "7" in kind else 1


def _round_up(v, m):
    return ((v + m - 1) // m) * m


def _row_tiling(m, num_tiles):
    # sublane multiple of 16 keeps bf16-packed activation blocks aligned
    tm = _round_up(max(1, -(-m // num_tiles)), 16)
    return tm, tm * num_tiles


# --------------------------------------------------------------------------------------
# Pallas kernels
# --------------------------------------------------------------------------------------
def _proj_kernel(xp_ref, scale_ref, cmask_ref, w_ref, b_ref, o_ref):
    # [x|pos] (bf16, K=2C) @ vstack([[Wv|Woff|Watt],[0|Woff|Watt]]) (bf16) -> f32 acc.
    # key_padding_mask zeroing of the value columns is fused in:
    #   factor = 1 + cmask*(scale-1);  cmask=1 on value columns, scale=0 on masked rows.
    acc = jnp.dot(xp_ref[...], w_ref[...], preferred_element_type=jnp.float32)
    factor = 1.0 + cmask_ref[...] * (scale_ref[...] - 1.0)
    o_ref[...] = (acc + b_ref[...]) * factor


def _layer_epilogue_kernel(a_ref, x_ref, wo_ref, bo_ref, w1_ref, b1_ref, w2_ref, b2_ref,
                           g0_ref, be0_ref, g1_ref, be1_ref, o_ref):
    # z = LayerNorm(x + a @ Wo + bo)                    (attn out-proj + residual + LN)
    # o = LayerNorm(z + ReLU(z@W1+b1)@W2 + b2)          (FFN + residual + LN), dropout=0
    y = jnp.dot(a_ref[...], wo_ref[...], preferred_element_type=jnp.float32) + bo_ref[...]
    z = x_ref[...] + y
    mu = jnp.mean(z, axis=-1, keepdims=True)
    var = jnp.mean((z - mu) ** 2, axis=-1, keepdims=True)
    z = (z - mu) * lax.rsqrt(var + _LN_EPS) * g0_ref[...] + be0_ref[...]

    h = jnp.maximum(jnp.dot(z.astype(jnp.bfloat16), w1_ref[...],
                            preferred_element_type=jnp.float32) + b1_ref[...], 0.0)
    y2 = jnp.dot(h.astype(jnp.bfloat16), w2_ref[...],
                 preferred_element_type=jnp.float32) + b2_ref[...]
    z2 = z + y2
    mu2 = jnp.mean(z2, axis=-1, keepdims=True)
    var2 = jnp.mean((z2 - mu2) ** 2, axis=-1, keepdims=True)
    o_ref[...] = (z2 - mu2) * lax.rsqrt(var2 + _LN_EPS) * g1_ref[...] + be1_ref[...]


def _row_spec(tm, n):
    return pl.BlockSpec((tm, n), lambda i: (i, 0))


def _full_spec(r, c):
    return pl.BlockSpec((r, c), lambda i: (0, 0))


def pallas_fused_proj(xp, scale, cmask, w, b, tm):
    """xp:(Mp,2C) bf16; scale:(Mp,1) f32; cmask,b:(1,N) f32; w:(2C,N) bf16 -> (Mp,N) f32."""
    mp, k = xp.shape
    n = w.shape[1]
    assert mp % tm == 0 and w.shape[0] == k
    return pl.pallas_call(
        _proj_kernel,
        out_shape=jax.ShapeDtypeStruct((mp, n), jnp.float32),
        grid=(mp // tm,),
        in_specs=[_row_spec(tm, k), _row_spec(tm, 1), _full_spec(1, n),
                  _full_spec(k, n), _full_spec(1, n)],
        out_specs=_row_spec(tm, n),
        compiler_params=pltpu.CompilerParams(dimension_semantics=("parallel",)),
    )(xp, scale, cmask, w, b)


def pallas_layer_epilogue(a, x, wo, bo, w1, b1, w2, b2, g0, be0, g1, be1, tm):
    """Fused attn-out-proj + residual + LN + FFN + residual + LN.

    a:(Mp,C) bf16; x:(Mp,C) f32 (residual stream, aliased to the output / updated in
    place); weights bf16; biases/LN params (1,·) f32.  Returns (Mp,C) f32.
    """
    mp, c = x.shape
    f = w1.shape[1]
    assert mp % tm == 0 and a.shape == (mp, c)
    return pl.pallas_call(
        _layer_epilogue_kernel,
        out_shape=jax.ShapeDtypeStruct((mp, c), jnp.float32),
        grid=(mp // tm,),
        in_specs=[_row_spec(tm, c), _row_spec(tm, c),
                  _full_spec(c, c), _full_spec(1, c),
                  _full_spec(c, f), _full_spec(1, f),
                  _full_spec(f, c), _full_spec(1, c),
                  _full_spec(1, c), _full_spec(1, c),
                  _full_spec(1, c), _full_spec(1, c)],
        out_specs=_row_spec(tm, c),
        input_output_aliases={1: 0},
        compiler_params=pltpu.CompilerParams(dimension_semantics=("parallel",)),
    )(a, x, wo, bo, w1, b1, w2, b2, g0, be0, g1, be1)


# --------------------------------------------------------------------------------------
# Glue (plain JAX): positional encoding, nearest-resize, reference points, sampling
# --------------------------------------------------------------------------------------
def sine_positional_encoding(mask, num_feats, temperature=10000, normalize=True,
                             scale=2.0 * math.pi, eps=1e-6, offset=0.0):
    """mmcv SinePositionalEncoding (num_feats = embed_dims//2)."""
    not_mask = (~mask).astype(jnp.float32)
    y_embed = jnp.cumsum(not_mask, axis=1)
    x_embed = jnp.cumsum(not_mask, axis=2)
    if normalize:
        y_embed = (y_embed + offset) / (y_embed[:, -1:, :] + eps) * scale
        x_embed = (x_embed + offset) / (x_embed[:, :, -1:] + eps) * scale
    dim_t = jnp.arange(num_feats, dtype=jnp.float32)
    dim_t = jnp.float32(temperature) ** (2.0 * (dim_t // 2) / num_feats)
    pos_x = x_embed[..., None] / dim_t
    pos_y = y_embed[..., None] / dim_t
    b, h, w = mask.shape
    pos_x = jnp.stack([jnp.sin(pos_x[..., 0::2]), jnp.cos(pos_x[..., 1::2])],
                      axis=4).reshape(b, h, w, -1)
    pos_y = jnp.stack([jnp.sin(pos_y[..., 0::2]), jnp.cos(pos_y[..., 1::2])],
                      axis=4).reshape(b, h, w, -1)
    return jnp.concatenate([pos_y, pos_x], axis=3).transpose(0, 3, 1, 2)


def interpolate_nearest(x, size):
    """F.interpolate(mode='nearest') on NCHW."""
    h_in, w_in = x.shape[-2], x.shape[-1]
    h_out, w_out = size
    rows = (jnp.arange(h_out) * h_in) // h_out
    cols = (jnp.arange(w_out) * w_in) // w_out
    return x[:, :, rows, :][:, :, :, cols]


def get_valid_ratio(mask):
    _, h, w = mask.shape
    valid_h = jnp.sum(~mask[:, :, 0], axis=1).astype(jnp.float32)
    valid_w = jnp.sum(~mask[:, 0, :], axis=1).astype(jnp.float32)
    return jnp.stack([valid_w / w, valid_h / h], axis=-1)


def get_reference_points(spatial_shapes, valid_ratios):
    ref_list = []
    for lvl, (h, w) in enumerate(spatial_shapes):
        ref_y, ref_x = jnp.meshgrid(
            jnp.linspace(0.5, h - 0.5, h, dtype=jnp.float32),
            jnp.linspace(0.5, w - 0.5, w, dtype=jnp.float32), indexing='ij')
        ref_y = ref_y.reshape(-1)[None] / (valid_ratios[:, None, lvl, 1] * h)
        ref_x = ref_x.reshape(-1)[None] / (valid_ratios[:, None, lvl, 0] * w)
        ref_list.append(jnp.stack([ref_x, ref_y], -1))
    reference_points = jnp.concatenate(ref_list, 1)
    return reference_points[:, :, None] * valid_ratios[:, None]


def grid_sample_bilinear(value, grid):
    """F.grid_sample(bilinear, zeros padding, align_corners=False); 4 corner gathers fused."""
    # TODO(synk): data-dependent bilinear gather kept in plain JAX (no clean Pallas TPU
    # gather path at this scale); corners are fused into a single take_along_axis.
    bsz, c, h, w = value.shape
    _, hg, wg, _ = grid.shape
    ix = (grid[..., 0] + 1.0) * w * 0.5 - 0.5
    iy = (grid[..., 1] + 1.0) * h * 0.5 - 0.5
    x0 = jnp.floor(ix)
    y0 = jnp.floor(iy)
    x1 = x0 + 1.0
    y1 = y0 + 1.0
    wx1 = ix - x0
    wx0 = 1.0 - wx1
    wy1 = iy - y0
    wy0 = 1.0 - wy1
    xs = jnp.stack([x0, x1, x0, x1], axis=1)            # (bsz, 4, hg, wg)
    ys = jnp.stack([y0, y0, y1, y1], axis=1)
    ws = jnp.stack([wx0 * wy0, wx1 * wy0, wx0 * wy1, wx1 * wy1], axis=1)
    valid = (xs >= 0) & (xs <= w - 1) & (ys >= 0) & (ys <= h - 1)
    # out-of-bounds (incl. NaN coords) contribute exactly 0, like torch's grid_sample.
    wgt = jnp.where(valid, ws, 0.0)
    xi = jnp.nan_to_num(jnp.clip(xs, 0, w - 1)).astype(jnp.int32)
    yi = jnp.nan_to_num(jnp.clip(ys, 0, h - 1)).astype(jnp.int32)
    flat = (yi * w + xi).reshape(bsz, 1, 4 * hg * wg)
    vflat = value.reshape(bsz, c, h * w)
    vals = jnp.take_along_axis(vflat, flat, axis=2).reshape(bsz, c, 4, hg, wg)
    return (vals * wgt[:, None]).sum(axis=2)


def ms_deform_attn_core(value, spatial_shapes, sampling_locations, attention_weights):
    bs, _, num_heads, head_dim = value.shape
    _, lq, _, num_levels, num_points, _ = sampling_locations.shape
    sampling_grids = 2.0 * sampling_locations - 1.0
    sampled = []
    start = 0
    for lvl, (h, w) in enumerate(spatial_shapes):
        v = value[:, start:start + h * w]
        start += h * w
        v = v.reshape(bs, h * w, num_heads * head_dim).transpose(0, 2, 1)
        v = v.reshape(bs * num_heads, head_dim, h, w)
        g = sampling_grids[:, :, :, lvl].transpose(0, 2, 1, 3, 4)
        g = g.reshape(bs * num_heads, lq, num_points, 2)
        sampled.append(grid_sample_bilinear(v, g))
    attw = attention_weights.transpose(0, 2, 1, 3, 4).reshape(
        bs * num_heads, 1, lq, num_levels * num_points)
    sampled = jnp.stack(sampled, axis=-2).reshape(
        bs * num_heads, head_dim, lq, num_levels * num_points)
    out = (sampled * attw).sum(-1).reshape(bs, num_heads * head_dim, lq)
    return out.transpose(0, 2, 1)


# --------------------------------------------------------------------------------------
# Deformable-DETR encoder (Pallas: fused proj, fused per-layer epilogue)
# --------------------------------------------------------------------------------------
def _prep_layer(lp):
    """Per-layer fused / bf16 weights for the Pallas kernels."""
    C = lp['Wv'].shape[0]
    f = lp['W1'].shape[1]
    w_top = jnp.concatenate([lp['Wv'], lp['Woff'], lp['Watt']], axis=1)
    w_bot = jnp.concatenate([jnp.zeros_like(lp['Wv']), lp['Woff'], lp['Watt']], axis=1)
    W = jnp.concatenate([w_top, w_bot], axis=0).astype(jnp.bfloat16)      # (2C, N)
    b = jnp.concatenate([lp['bv'], lp['boff'], lp['batt']]).reshape(1, -1).astype(jnp.float32)
    return dict(
        W=W, b=b,
        Wo=lp['Wo'].astype(jnp.bfloat16), bo=lp['bo'].reshape(1, C).astype(jnp.float32),
        W1=lp['W1'].astype(jnp.bfloat16), b1=lp['b1'].reshape(1, f).astype(jnp.float32),
        W2=lp['W2'].astype(jnp.bfloat16), b2=lp['b2'].reshape(1, C).astype(jnp.float32),
        g0=lp['g0'].reshape(1, C).astype(jnp.float32),
        be0=lp['be0'].reshape(1, C).astype(jnp.float32),
        g1=lp['g1'].reshape(1, C).astype(jnp.float32),
        be1=lp['be1'].reshape(1, C).astype(jnp.float32))


def run_encoder(layer_params, query, query_pos, key_padding_mask, reference_points,
                spatial_shapes, num_heads, num_points):
    # TODO(synk): the reference __init__ has encoder=None (no config given); a standard
    # DeformableDetrTransformerEncoder is instantiated: per layer
    # ('self_attn','norm','ffn','norm') with MS-deformable attention, dropout=0.
    # The encoder runs batch-first internally ((bs*L, C) flattening): identical per-token
    # math to the reference's (L, bs, C) layout, without per-layer transposes.
    bs, L, C = query.shape
    M = bs * L
    num_levels = len(spatial_shapes)
    HLP = num_heads * num_levels * num_points
    head_dim = C // num_heads
    N = C + 3 * HLP

    num_tiles = _num_row_tiles()
    tm, mp = _row_tiling(M, num_tiles)
    pad = mp - M

    x = query.reshape(M, C).astype(jnp.float32)                  # residual stream, f32
    pos = query_pos.reshape(M, C).astype(jnp.bfloat16)           # matmul-only -> bf16
    # key_padding_mask zeroing of the value projection is folded into the proj kernel:
    scale = jnp.where(key_padding_mask.reshape(M, 1), 0.0, 1.0).astype(jnp.float32)
    cmask = (jnp.arange(N) < C).astype(jnp.float32).reshape(1, N)
    if pad:
        x = jnp.pad(x, ((0, pad), (0, 0)))
        pos = jnp.pad(pos, ((0, pad), (0, 0)))
        scale = jnp.pad(scale, ((0, pad), (0, 0)))

    offset_normalizer = jnp.array([[w, h] for (h, w) in spatial_shapes], jnp.float32)

    for lp_raw in layer_params:
        lp = _prep_layer(lp_raw)

        # fused value / sampling_offsets / attention_weights projection: one K=2C matmul,
        # lane-dense (N = C + 3*HLP = 128) output, mask folded in.
        xp = jnp.concatenate([x.astype(jnp.bfloat16), pos], axis=1)       # (mp, 2C) bf16
        proj = pallas_fused_proj(xp, scale, cmask, lp['W'], lp['b'], tm)
        if pad:
            proj = proj[:M]

        value = proj[:, :C].reshape(bs, L, num_heads, head_dim)
        off = proj[:, C:C + 2 * HLP].reshape(bs, L, num_heads, num_levels, num_points, 2)
        attw = jax.nn.softmax(
            proj[:, C + 2 * HLP:].reshape(bs, L, num_heads, num_levels * num_points), -1)
        attw = attw.reshape(bs, L, num_heads, num_levels, num_points)

        sampling_locations = (reference_points[:, :, None, :, None, :]
                              + off / offset_normalizer[None, None, None, :, None, :])
        attn = ms_deform_attn_core(value, spatial_shapes, sampling_locations, attw)
        attn = attn.reshape(M, C).astype(jnp.bfloat16)            # matmul-only -> bf16
        if pad:
            attn = jnp.pad(attn, ((0, pad), (0, 0)))

        # fused: output-proj + residual + LN + FFN + residual + LN (single pallas_call,
        # residual stream aliased in place).
        x = pallas_layer_epilogue(attn, x, lp['Wo'], lp['bo'], lp['W1'], lp['b1'],
                                  lp['W2'], lp['b2'], lp['g0'], lp['be0'],
                                  lp['g1'], lp['be1'], tm)

    if pad:
        x = x[:M]
    return x.reshape(bs, L, C)


# --------------------------------------------------------------------------------------
# DeformableTemporal forward
# --------------------------------------------------------------------------------------
def deformable_temporal_forward(params, feats, embed_dims, num_feature_levels,
                                num_heads, num_points):
    num_feats_pos = embed_dims // 2      # SinePositionalEncoding(num_feats=embed_dims//2)
    temp_dim = num_feature_levels
    mlvl_dim = len(feats)
    mlvl_feats = [[feats[level][:, t] for t in range(temp_dim)] for level in range(mlvl_dim)]

    encoded_mlvl_feats = []
    for level_ in range(mlvl_dim):
        temp_feats_ = list(mlvl_feats[level_])
        batch_size = mlvl_feats[0][0].shape[0]
        temp_masks = []
        mlvl_positional_encodings = []
        # img_masks = ones((bs, 900, 1600)); the reference never zeroes the valid region,
        # so nearest-resizing gives an all-True mask at every feature resolution.
        for feat_idx in range(len(temp_feats_)):
            if feat_idx != 0:
                h_new = int(temp_feats_[feat_idx].shape[-2] / 3)
                w_new = int(temp_feats_[feat_idx].shape[-1] / 3)
                temp_feats_[feat_idx] = interpolate_nearest(temp_feats_[feat_idx],
                                                            (h_new, w_new))
            h, w = temp_feats_[feat_idx].shape[-2], temp_feats_[feat_idx].shape[-1]
            mask = jnp.ones((batch_size, h, w), dtype=bool)
            temp_masks.append(mask)
            mlvl_positional_encodings.append(sine_positional_encoding(mask, num_feats_pos))

        feat_flatten, mask_flatten, lvl_pos_embed_flatten, spatial_shapes = [], [], [], []
        for lvl, (feat, mask, pos_embed) in enumerate(
                zip(temp_feats_, temp_masks, mlvl_positional_encodings)):
            bs, c, h, w = feat.shape
            spatial_shapes.append((h, w))
            feat = feat.reshape(bs, c, h * w).transpose(0, 2, 1)
            mask = mask.reshape(bs, h * w)
            pos_embed = pos_embed.reshape(bs, c, h * w).transpose(0, 2, 1)
            lvl_pos_embed = pos_embed + params['level_embeds'][lvl].reshape(1, 1, -1)
            lvl_pos_embed_flatten.append(lvl_pos_embed)
            feat_flatten.append(feat)
            mask_flatten.append(mask)
        feat_flatten = jnp.concatenate(feat_flatten, 1)              # (bs, L, C)
        mask_flatten = jnp.concatenate(mask_flatten, 1)
        lvl_pos_embed_flatten = jnp.concatenate(lvl_pos_embed_flatten, 1)

        valid_ratios = jnp.stack([get_valid_ratio(m) for m in temp_masks], 1)
        reference_points = get_reference_points(spatial_shapes, valid_ratios)

        # batch-first into the encoder; the reference's (L,bs,C) permute + un-permute is
        # per-token math only, so the result is identical.
        memory = run_encoder(params['layers'], feat_flatten, lvl_pos_embed_flatten,
                             mask_flatten, reference_points, spatial_shapes,
                             num_heads, num_points)                  # (bs, L, C)

        bs, c, h, w = temp_feats_[0].shape
        target_memory = memory[:, :h * w, :]
        target_memory = target_memory.reshape(bs, h, w, c).transpose(0, 3, 1, 2)
        encoded_mlvl_feats.append(target_memory)
    return encoded_mlvl_feats


# --------------------------------------------------------------------------------------
# Deterministic synthetic parameters
# --------------------------------------------------------------------------------------
def init_params(key, embed_dims, num_feature_levels, num_heads, num_points,
                num_layers, ffn_dim):
    C = embed_dims
    keys = list(jax.random.split(key, 64))
    ki = iter(keys)

    def w(shape, scale=0.02):
        return scale * jax.random.normal(next(ki), shape, jnp.float32)

    params = {}
    params['level_embeds'] = jax.random.normal(next(ki), (num_feature_levels, C),
                                               jnp.float32)          # normal_()
    # reference_points Linear(embed_dims, 2): created in init_layers but unused in forward
    params['reference_points_w'] = w((C, 2))
    params['reference_points_b'] = jnp.zeros((2,), jnp.float32)

    # mmcv MultiScaleDeformableAttention init: sampling_offsets weight=0, bias=grid init;
    # attention_weights weight=bias=0 (softmax -> uniform).
    thetas = jnp.arange(num_heads, dtype=jnp.float32) * (2.0 * math.pi / num_heads)
    grid_init = jnp.stack([jnp.cos(thetas), jnp.sin(thetas)], -1)
    grid_init = grid_init / jnp.max(jnp.abs(grid_init), axis=-1, keepdims=True)
    grid_init = jnp.tile(grid_init[:, None, None, :], (1, num_feature_levels, num_points, 1))
    grid_init = grid_init * jnp.arange(1, num_points + 1, dtype=jnp.float32)[None, None, :, None]
    off_bias = grid_init.reshape(-1)

    HLP = num_heads * num_feature_levels * num_points
    layers = []
    for _ in range(num_layers):
        layers.append(dict(
            Wv=w((C, C)), bv=jnp.zeros((C,), jnp.float32),
            Woff=jnp.zeros((C, HLP * 2), jnp.float32), boff=off_bias,
            Watt=jnp.zeros((C, HLP), jnp.float32), batt=jnp.zeros((HLP,), jnp.float32),
            Wo=w((C, C)), bo=jnp.zeros((C,), jnp.float32),
            g0=jnp.ones((C,), jnp.float32), be0=jnp.zeros((C,), jnp.float32),
            W1=w((C, ffn_dim)), b1=jnp.zeros((ffn_dim,), jnp.float32),
            W2=w((ffn_dim, C)), b2=jnp.zeros((C,), jnp.float32),
            g1=jnp.ones((C,), jnp.float32), be1=jnp.zeros((C,), jnp.float32),
        ))
    params['layers'] = layers
    return params


# --------------------------------------------------------------------------------------
if __name__ == "__main__":
    embed_dims = 32
    num_feature_levels = 2   # temporal frames (== MSDeformAttn num_levels here)
    num_heads = 4
    num_points = 4
    num_layers = 2
    ffn_dim = 64
    bs, H, W = 2, 12, 12

    key = jax.random.PRNGKey(0)
    kp, kf, ka, kb, kc, km = jax.random.split(key, 6)
    params = init_params(kp, embed_dims, num_feature_levels, num_heads,
                         num_points, num_layers, ffn_dim)

    # feats: list (len = num feature-map levels) of (bs, temp, C, H, W) tensors
    feats = [jax.random.normal(kf, (bs, num_feature_levels, embed_dims, H, W),
                               jnp.float32)]

    # ---- sanity: Pallas kernels vs XLA on finite data ----------------------------------
    C = embed_dims
    HLP = num_heads * num_feature_levels * num_points
    N = C + 3 * HLP
    num_tiles = _num_row_tiles()
    tm, Mt = _row_tiling(320, num_tiles)

    xt = jax.random.normal(ka, (Mt, C), jnp.float32)
    pt = jax.random.normal(kb, (Mt, C), jnp.float32)
    at = jax.random.normal(kc, (Mt, C), jnp.float32)
    maskt = jax.random.bernoulli(km, 0.25, (Mt, 1))
    scale_t = jnp.where(maskt, 0.0, 1.0).astype(jnp.float32)
    cmask_t = (jnp.arange(N) < C).astype(jnp.float32).reshape(1, N)

    lp0 = params['layers'][0]
    lpp = _prep_layer(lp0)

    # fused projection (one K=2C matmul + fused value masking)
    xp_t = jnp.concatenate([xt.astype(jnp.bfloat16), pt.astype(jnp.bfloat16)], axis=1)
    got = pallas_fused_proj(xp_t, scale_t, cmask_t, lpp['W'], lpp['b'], tm)
    w_top = jnp.concatenate([lp0['Wv'], lp0['Woff'], lp0['Watt']], 1)
    w_bot = jnp.concatenate([jnp.zeros_like(lp0['Wv']), lp0['Woff'], lp0['Watt']], 1)
    b_all = jnp.concatenate([lp0['bv'], lp0['boff'], lp0['batt']])
    ref = (xt @ w_top + pt @ w_bot + b_all[None]) * (1.0 + cmask_t * (scale_t - 1.0))
    assert jnp.allclose(got, ref, atol=5e-2, rtol=5e-2), "fused proj mismatch"

    # fused per-layer epilogue (out-proj + res + LN + FFN + res + LN)
    got = pallas_layer_epilogue(at.astype(jnp.bfloat16), xt + 0.0,  # fresh copy: aliased
                                lpp['Wo'], lpp['bo'], lpp['W1'], lpp['b1'],
                                lpp['W2'], lpp['b2'], lpp['g0'], lpp['be0'],
                                lpp['g1'], lpp['be1'], tm)
    z = xt + at @ lp0['Wo'] + lp0['bo']
    mu = z.mean(-1, keepdims=True)
    var = ((z - mu) ** 2).mean(-1, keepdims=True)
    z = (z - mu) / jnp.sqrt(var + _LN_EPS) * lp0['g0'] + lp0['be0']
    hh = jnp.maximum(z @ lp0['W1'] + lp0['b1'], 0.0)
    z2 = z + hh @ lp0['W2'] + lp0['b2']
    mu2 = z2.mean(-1, keepdims=True)
    var2 = ((z2 - mu2) ** 2).mean(-1, keepdims=True)
    ref = (z2 - mu2) / jnp.sqrt(var2 + _LN_EPS) * lp0['g1'] + lp0['be1']
    assert jnp.allclose(got, ref, atol=5e-2, rtol=5e-2), "layer epilogue mismatch"

    # ---- full forward, one jitted program ----------------------------------------------
    fwd = jax.jit(deformable_temporal_forward, static_argnums=(2, 3, 4, 5))
    outs = fwd(params, feats, embed_dims, num_feature_levels, num_heads, num_points)
    outs = [jax.block_until_ready(o) for o in outs]
    assert len(outs) == 1 and outs[0].shape == (bs, embed_dims, H, W)
    assert bool(jnp.isfinite(outs[0]).all())
    print("KERNEL_OK")
</pallas_src>

<mosaic_0001>
module attributes {stable_mosaic.version = 11 : i64} {
  func.func @_proj_kernel(%arg0: i32, %arg1: memref<320x64xbf16, #tpu.memory_space<vmem>>, %arg2: memref<320x1xf32, #tpu.memory_space<vmem>>, %arg3: memref<1x128xf32, #tpu.memory_space<vmem>>, %arg4: memref<64x128xbf16, #tpu.memory_space<vmem>>, %arg5: memref<1x128xf32, #tpu.memory_space<vmem>>, %arg6: memref<320x128xf32, #tpu.memory_space<vmem>>) attributes {dimension_semantics = [#tpu.dimension_semantics<parallel>], iteration_bounds = array<i64: 1>, scalar_prefetch = 0 : i64, scratch_operands = 0 : i64, tpu.core_type = #tpu.core_type<tc>, window_params = [{transform_indices = @transform_0, window_bounds = array<i64: 320, 64>}, {transform_indices = @transform_1, window_bounds = array<i64: 320, 1>}, {pipeline_mode = #tpu.pipeline_mode<synchronous>, transform_indices = @transform_2, window_bounds = array<i64: 1, 128>}, {pipeline_mode = #tpu.pipeline_mode<synchronous>, transform_indices = @transform_3, window_bounds = array<i64: 64, 128>}, {pipeline_mode = #tpu.pipeline_mode<synchronous>, transform_indices = @transform_4, window_bounds = array<i64: 1, 128>}, {transform_indices = @transform_5, window_bounds = array<i64: 320, 128>}]} {
    %c0 = arith.constant 0 : index
    %c0_0 = arith.constant 0 : index
    %0 = vector.load %arg1[%c0, %c0_0] : memref<320x64xbf16, #tpu.memory_space<vmem>>, vector<320x64xbf16>
    %c0_1 = arith.constant 0 : index
    %c0_2 = arith.constant 0 : index
    %1 = vector.load %arg4[%c0_1, %c0_2] : memref<64x128xbf16, #tpu.memory_space<vmem>>, vector<64x128xbf16>
    %cst = arith.constant dense<0.000000e+00> : vector<320x128xf32>
    %2 = tpu.matmul %0, %1, %cst {dimension_numbers = #tpu.dot_dimension_numbers<[1], [0], [0], [1], [0, 0, 1, 1], [], []>} : vector<320x64xbf16>, vector<64x128xbf16>, vector<320x128xf32> -> vector<320x128xf32>
    %c0_3 = arith.constant 0 : index
    %c0_4 = arith.constant 0 : index
    %3 = vector.load %arg3[%c0_3, %c0_4] : memref<1x128xf32, #tpu.memory_space<vmem>>, vector<1x128xf32>
    %c0_5 = arith.constant 0 : index
    %c0_6 = arith.constant 0 : index
    %4 = vector.load %arg2[%c0_5, %c0_6] : memref<320x1xf32, #tpu.memory_space<vmem>>, vector<320x1xf32>
    %cst_7 = arith.constant 1.000000e+00 : f32
    %5 = vector.broadcast %cst_7 : f32 to vector<320x1xf32>
    %6 = arith.subf %4, %5 : vector<320x1xf32>
    %7 = vector.broadcast %3 : vector<1x128xf32> to vector<320x128xf32>
    %8 = vector.broadcast %6 : vector<320x1xf32> to vector<320x128xf32>
    %9 = arith.mulf %7, %8 : vector<320x128xf32>
    %cst_8 = arith.constant 1.000000e+00 : f32
    %10 = vector.broadcast %cst_8 : f32 to vector<320x128xf32>
    %11 = arith.addf %10, %9 : vector<320x128xf32>
    %c0_9 = arith.constant 0 : index
    %c0_10 = arith.constant 0 : index
    %12 = vector.load %arg5[%c0_9, %c0_10] : memref<1x128xf32, #tpu.memory_space<vmem>>, vector<1x128xf32>
    %13 = vector.broadcast %12 : vector<1x128xf32> to vector<320x128xf32>
    %14 = arith.addf %2, %13 : vector<320x128xf32>
    %15 = arith.mulf %14, %11 : vector<320x128xf32>
    %c0_11 = arith.constant 0 : index
    %c0_12 = arith.constant 0 : index
    %16 = vector.load %arg6[%c0_11, %c0_12] : memref<320x128xf32, #tpu.memory_space<vmem>>, vector<320x128xf32>
    tpu.vector_store %arg6[%c0_11, %c0_12], %15 {strides = array<i32>} : memref<320x128xf32, #tpu.memory_space<vmem>>, vector<320x128xf32>,
    return
  }
  func.func @transform_0(%arg0: i32) -> (i32, i32) {
    %c0_i32 = arith.constant 0 : i32
    %c0_i32_0 = arith.constant 0 : i32
    return %arg0, %c0_i32 : i32, i32
  }
  func.func @transform_1(%arg0: i32) -> (i32, i32) {
    %c0_i32 = arith.constant 0 : i32
    %c0_i32_0 = arith.constant 0 : i32
    return %arg0, %c0_i32 : i32, i32
  }
  func.func @transform_2(%arg0: i32) -> (i32, i32) {
    %c0_i32 = arith.constant 0 : i32
    %c0_i32_0 = arith.constant 0 : i32
    %c0_i32_1 = arith.constant 0 : i32
    return %c0_i32, %c0_i32_0 : i32, i32
  }
  func.func @transform_3(%arg0: i32) -> (i32, i32) {
    %c0_i32 = arith.constant 0 : i32
    %c0_i32_0 = arith.constant 0 : i32
    %c0_i32_1 = arith.constant 0 : i32
    return %c0_i32, %c0_i32_0 : i32, i32
  }
  func.func @transform_4(%arg0: i32) -> (i32, i32) {
    %c0_i32 = arith.constant 0 : i32
    %c0_i32_0 = arith.constant 0 : i32
    %c0_i32_1 = arith.constant 0 : i32
    return %c0_i32, %c0_i32_0 : i32, i32
  }
  func.func @transform_5(%arg0: i32) -> (i32, i32) {
    %c0_i32 = arith.constant 0 : i32
    %c0_i32_0 = arith.constant 0 : i32
    return %arg0, %c0_i32 : i32, i32
  }
}

</mosaic_0001>

<bundles_post_ra>
// kernel: tpu_custom_call.1
= control target key start
LH: loop header
LB: loop body
LE: loop exit
PB: predicated region body
PF: predicated region fallthrough
CT: control target
= control target key end

     0   :  { %v1136_v2 = vmov 0   ;;  %vm568_vm0 = vcmask 523264   ;;  %s1547_s0 = inlined_call_operand.vmem [shape: bf16[320,64], index: 0, kind: input, shape index: {}]   ;;  %s1548_s1 = inlined_call_operand.vmem [shape: f32[320,1], index: 1, kind: input, shape index: {}]   ;;  %s1549_s2 = inlined_call_operand.vmem [shape: f32[1,128], index: 2, kind: input, shape index: {}]   ;;  %s1550_s3 = inlined_call_operand.vmem [shape: bf16[64,128], index: 3, kind: input, shape index: {}]   ;;  %s1551_s4 = inlined_call_operand.vmem [shape: f32[1,128], index: 4, kind: input, shape index: {}]   ;;  %s1552_s5 = inlined_call_operand.hbm [shape: f32[320,128], index: 5, kind: output, shape index: {}]  }
   0x1   :  { %v73_v0 = vld [vmem:[%s1548_s1 + $0x10] sm:$0xff]  ;;  %v71_v1 = vld [vmem:[%s1548_s1] sm:$0xff]  ;;  %1089 = vset.pattern.permute.xlu1 %v1136_v2  ;;  %1088 = vset.pattern.permute.xlu0 %v1136_v2  ;;  %v1090_v5 = vld [vmem:[%s1550_s3 + $0x18] sm:$0xff]  }
   0x2   :  { %v920_v3 = vadd.f32 -1.0, %v73_v0  ;;  %v918_v4 = vadd.f32 -1.0, %v71_v1  ;;  %v74_v6 = vld [vmem:[%s1548_s1 + $0x18] sm:$0xff]  ;;  %v72_v7 = vld [vmem:[%s1548_s1 + $0x8] sm:$0xff]  ;;  %v1091_v10 = vld [vmem:[%s1550_s3 + $0x10] sm:$0xff]   ;;  %1028 = vmatprep.subr.bf16.mxu0 %v1090_v5  ;;  %1076 = vmatprep.subr.bf16.mxu1 %v1090_v5 }
   0x3   :  { %v921_v8 = vadd.f32 -1.0, %v74_v6  ;;  %v919_v9 = vadd.f32 -1.0, %v72_v7  ;;  %v76_v11 = vld [vmem:[%s1548_s1 + $0x28] sm:$0xff]  ;;  %v75_v12 = vld [vmem:[%s1548_s1 + $0x20] sm:$0xff]  ;;  %1029 = vmatpush3.bf16.msra.mxu0 %v1090_v5  ;;  %1080 = vmatpush3.bf16.msra.mxu1 %v1090_v5  ;;  %v78_v15 = vld [vmem:[%s1548_s1 + $0x38] sm:$0xff] }
   0x4   :  { %169 = vperm.xlu1 %1089, %v920_v3   ;;  %159 = vperm.xlu0 %1088, %v918_v4   ;;  %v1092_v13 = vld [vmem:[%s1550_s3 + $0x8] sm:$0xff]   ;;  %v923_v14 = vadd.f32 -1.0, %v76_v11  ;;  %v922_v16 = vadd.f32 -1.0, %v75_v12  ;;  %v77_v17 = vld [vmem:[%s1548_s1 + $0x30] sm:$0xff]  ;;  %v1094_v18 = vld [vmem:[%s1547_s0] sm:$0xff]   ;;  %v925_v21 = vadd.f32 -1.0, %v78_v15 }
   0x5   :  { %1030 = vmatprep.subr.bf16.mxu0 %v1091_v10  ;;  %1077 = vmatprep.subr.bf16.mxu1 %v1091_v10  ;;  %v1095_v19 = vld [vmem:[%s1547_s0 + $0x50] sm:$0xff]   ;;  %v1093_v20 = vld [vmem:[%s1550_s3] sm:$0xff]   ;;  %v924_v22 = vadd.f32 -1.0, %v77_v17  ;;  %v80_v23 = vld [vmem:[%s1548_s1 + $0x48] sm:$0xff] }
   0x6   :  { %1036 = vmatprep.mubr.msk.bf16.mxu0 %vm568_vm0, %v1094_v18  ;;  %1056 = vmatprep.mubr.msk.bf16.mxu1 %vm568_vm0, %v1095_v19  ;;  %v79_v24 = vld [vmem:[%s1548_s1 + $0x40] sm:$0xff]  ;;  %v1096_v25 = vld [vmem:[%s1547_s0 + $0x8] sm:$0xff]   ;;  %v927_v26 = vadd.f32 -1.0, %v80_v23  ;;  %v1097_v28 = vld [vmem:[%s1547_s0 + $0x58] sm:$0xff]  }
   0x7   :  { %1031 = vmatpush3.bf16.msra.mxu0 %v1091_v10  ;;  %1081 = vmatpush3.bf16.msra.mxu1 %v1091_v10  ;;  %v926_v27 = vadd.f32 -1.0, %v79_v24  ;;  %v82_v29 = vld [vmem:[%s1548_s1 + $0x58] sm:$0xff]  ;;  %v81_v30 = vld [vmem:[%s1548_s1 + $0x50] sm:$0xff]  ;;  %v1099_v32 = vld [vmem:[%s1547_s0 + $0x60] sm:$0xff]  }
   0x8   :  { %174 = vperm.xlu1 %1089, %v921_v8   ;;  %164 = vperm.xlu0 %1088, %v919_v9   ;;  %v1098_v31 = vld [vmem:[%s1547_s0 + $0x10] sm:$0xff]   ;;  %v929_v33 = vadd.f32 -1.0, %v82_v29  ;;  %v928_v34 = vadd.f32 -1.0, %v81_v30  ;;  %v84_v35 = vld [vmem:[%s1548_s1 + $0x68] sm:$0xff]  ;;  %v83_v36 = vld [vmem:[%s1548_s1 + $0x60] sm:$0xff] }
   0x9   :  { %1032 = vmatprep.subr.bf16.mxu0 %v1092_v13  ;;  %1078 = vmatprep.subr.bf16.mxu1 %v1092_v13  ;;  %v931_v37 = vadd.f32 -1.0, %v84_v35  ;;  %v1100_v38 = vld [vmem:[%s1547_s0 + $0x18] sm:$0xff]   ;;  %v930_v39 = vadd.f32 -1.0, %v83_v36  ;;  %v1101_v40 = vld [vmem:[%s1547_s0 + $0x68] sm:$0xff]   ;;  %v85_v42 = vld [vmem:[%s1548_s1 + $0x70] sm:$0xff] }
   0xa   :  { %v86_v41 = vld [vmem:[%s1548_s1 + $0x78] sm:$0xff]  ;;  %v1102_v43 = vld [vmem:[%s1547_s0 + $0x20] sm:$0xff]   ;;  %v1103_v44 = vld [vmem:[%s1547_s0 + $0x70] sm:$0xff]   ;;  %v932_v46 = vadd.f32 -1.0, %v85_v42 }
   0xb   :  { %1033 = vmatpush3.bf16.msra.mxu0 %v1092_v13  ;;  %1082 = vmatpush3.bf16.msra.mxu1 %v1092_v13  ;;  %v933_v45 = vadd.f32 -1.0, %v86_v41  ;;  %v88_v47 = vld [vmem:[%s1548_s1 + $0x88] sm:$0xff]  ;;  %v87_v48 = vld [vmem:[%s1548_s1 + $0x80] sm:$0xff]  ;;  %v1105_v51 = vld [vmem:[%s1547_s0 + $0x78] sm:$0xff]  }
   0xc   :  { %184 = vperm.xlu1 %1089, %v923_v14   ;;  %179 = vperm.xlu0 %1088, %v922_v16   ;;  %v935_v49 = vadd.f32 -1.0, %v88_v47  ;;  %v1104_v50 = vld [vmem:[%s1547_s0 + $0x28] sm:$0xff]   ;;  %v934_v52 = vadd.f32 -1.0, %v87_v48  ;;  %v90_v53 = vld [vmem:[%s1548_s1 + $0x98] sm:$0xff]  ;;  %v89_v54 = vld [vmem:[%s1548_s1 + $0x90] sm:$0xff] }
   0xd   :  { %1034 = vmatprep.subr.bf16.mxu0 %v1093_v20  ;;  %1079 = vmatprep.subr.bf16.mxu1 %v1093_v20  ;;  %v1106_v55 = vld [vmem:[%s1547_s0 + $0x30] sm:$0xff]   ;;  %v1107_v56 = vld [vmem:[%s1547_s0 + $0x80] sm:$0xff]   ;;  %v937_v57 = vadd.f32 -1.0, %v90_v53  ;;  %v936_v58 = vadd.f32 -1.0, %v89_v54  ;;  %v92_v59 = vld [vmem:[%s1548_s1 + $0xa8] sm:$0xff] }
   0xe   :  { %v91_v60 = vld [vmem:[%s1548_s1 + $0xa0] sm:$0xff]  ;;  %v939_v61 = vadd.f32 -1.0, %v92_v59  ;;  %v1108_v63 = vld [vmem:[%s1547_s0 + $0x38] sm:$0xff]   ;;  %v1109_v0 = vld [vmem:[%s1547_s0 + $0x88] sm:$0xff]  }
   0xf   :  { %1035 = vmatpush3.bf16.msra.mxu0 %v1093_v20  ;;  %1083 = vmatpush3.bf16.msra.mxu1 %v1093_v20  ;;  %v938_v62 = vadd.f32 -1.0, %v91_v60  ;;  %v94_v1 = vld [vmem:[%s1548_s1 + $0xb8] sm:$0xff]  ;;  %v93_v2 = vld [vmem:[%s1548_s1 + $0xb0] sm:$0xff]  ;;  %v1110_v3 = vld [vmem:[%s1547_s0 + $0x40] sm:$0xff]  }
  0x10   :  { %194 = vperm.xlu1 %1089, %v925_v21   ;;  %189 = vperm.xlu0 %1088, %v924_v22   ;;  %v1111_v4 = vld [vmem:[%s1547_s0 + $0x90] sm:$0xff]  }
  0x12   :  { %1037 = vmatmul.mubr.msk.bf16.vlgmr.msra.gmra.mxu0 %vm568_vm0, %v1096_v25  ;;  %1057 = vmatmul.mubr.msk.bf16.vlgmr.msra.gmra.mxu1 %vm568_vm0, %v1097_v28 }
  0x13   :  { %1040 = vmatprep.mubr.msk.bf16.mxu0 %vm568_vm0, %v1098_v31  ;;  %1060 = vmatprep.mubr.msk.bf16.mxu1 %vm568_vm0, %v1099_v32 }
  0x14   :  { %204 = vperm.xlu1 %1089, %v927_v26   ;;  %199 = vperm.xlu0 %1088, %v926_v27  }
  0x18   :  { %214 = vperm.xlu1 %1089, %v929_v33   ;;  %209 = vperm.xlu0 %1088, %v928_v34  }
  0x1a   :  { %1041 = vmatmul.mubr.msk.bf16.gmra.mxu0 %vm568_vm0, %v1100_v38  ;;  %1061 = vmatmul.mubr.msk.bf16.gmra.mxu1 %vm568_vm0, %v1101_v40 }
  0x1b   :  { %1044 = vmatprep.mubr.msk.bf16.mxu0 %vm568_vm0, %v1102_v43  ;;  %1064 = vmatprep.mubr.msk.bf16.mxu1 %vm568_vm0, %v1103_v44 }
  0x1c   :  { %224 = vperm.xlu1 %1089, %v931_v37   ;;  %219 = vperm.xlu0 %1088, %v930_v39  }
  0x20   :  { %234 = vperm.xlu1 %1089, %v933_v45   ;;  %229 = vperm.xlu0 %1088, %v932_v46  }
  0x22   :  { %1045 = vmatmul.mubr.msk.bf16.gmra.mxu0 %vm568_vm0, %v1104_v50  ;;  %1065 = vmatmul.mubr.msk.bf16.gmra.mxu1 %vm568_vm0, %v1105_v51 }
  0x23   :  { %1048 = vmatprep.mubr.msk.bf16.mxu0 %vm568_vm0, %v1106_v55  ;;  %1068 = vmatprep.mubr.msk.bf16.mxu1 %vm568_vm0, %v1107_v56 }
  0x24   :  { %244 = vperm.xlu1 %1089, %v935_v49   ;;  %239 = vperm.xlu0 %1088, %v934_v52  }
  0x28   :  { %254 = vperm.xlu1 %1089, %v937_v57   ;;  %249 = vperm.xlu0 %1088, %v936_v58  }
  0x29   :  { %10 = vsyncpa [#allocation3], 0  ;;  %v941_v5 = vadd.f32 -1.0, %v94_v1  ;;  %v940_v6 = vadd.f32 -1.0, %v93_v2  ;;  %v96_v7 = vld [vmem:[%s1548_s1 + $0xc8] sm:$0xff]  ;;  %v95_v8 = vld [vmem:[%s1548_s1 + $0xc0] sm:$0xff] }
  0x2a   :  { %1049 = vmatmul.mubr.msk.bf16.gmra.mxu0 %vm568_vm0, %v1108_v63  ;;  %1069 = vmatmul.mubr.msk.bf16.gmra.mxu1 %vm568_vm0, %v1109_v0  ;;  %v943_v9 = vadd.f32 -1.0, %v96_v7  ;;  %v942_v10 = vadd.f32 -1.0, %v95_v8  ;;  %v1112_v11 = vld [vmem:[%s1547_s0 + $0x48] sm:$0xff]   ;;  %v1113_v12 = vld [vmem:[%s1547_s0 + $0x98] sm:$0xff]   ;;  %v97_v14 = vld [vmem:[%s1548_s1 + $0xd0] sm:$0xff] }
  0x2b   :  { %1052 = vmatprep.mubr.msk.bf16.mxu0 %vm568_vm0, %v1110_v3  ;;  %1072 = vmatprep.mubr.msk.bf16.mxu1 %vm568_vm0, %v1111_v4  ;;  %v98_v13 = vld [vmem:[%s1548_s1 + $0xd8] sm:$0xff]  ;;  %v944_v16 = vadd.f32 -1.0, %v97_v14  ;;  %v100_v17 = vld [vmem:[%s1548_s1 + $0xe8] sm:$0xff]  ;;  %v99_v18 = vld [vmem:[%s1548_s1 + $0xe0] sm:$0xff] }
  0x2c   :  { %264 = vperm.xlu1 %1089, %v939_v61   ;;  %259 = vperm.xlu0 %1088, %v938_v62   ;;  %v945_v15 = vadd.f32 -1.0, %v98_v13  ;;  %v947_v19 = vadd.f32 -1.0, %v100_v17  ;;  %v946_v20 = vadd.f32 -1.0, %v99_v18  ;;  %v102_v21 = vld [vmem:[%s1548_s1 + $0xf8] sm:$0xff]  ;;  %v101_v22 = vld [vmem:[%s1548_s1 + $0xf0] sm:$0xff]  ;;  %v104_v25 = vld [vmem:[%s1548_s1 + $0x108] sm:$0xff] }
  0x2d   :  { %v949_v23 = vadd.f32 -1.0, %v102_v21  ;;  %v948_v24 = vadd.f32 -1.0, %v101_v22  ;;  %v103_v26 = vld [vmem:[%s1548_s1 + $0x100] sm:$0xff]  ;;  %v951_v27 = vadd.f32 -1.0, %v104_v25  ;;  %v106_v29 = vld [vmem:[%s1548_s1 + $0x118] sm:$0xff]  ;;  %v105_v30 = vld [vmem:[%s1548_s1 + $0x110] sm:$0xff] }
  0x2e   :  { %v950_v28 = vadd.f32 -1.0, %v103_v26  ;;  %v953_v31 = vadd.f32 -1.0, %v106_v29  ;;  %v952_v32 = vadd.f32 -1.0, %v105_v30  ;;  %v108_v33 = vld [vmem:[%s1548_s1 + $0x128] sm:$0xff]  ;;  %v107_v34 = vld [vmem:[%s1548_s1 + $0x120] sm:$0xff]  ;;  %v110_v37 = vld [vmem:[%s1548_s1 + $0x138] sm:$0xff] }
  0x2f   :  { %v955_v35 = vadd.f32 -1.0, %v108_v33  ;;  %v954_v36 = vadd.f32 -1.0, %v107_v34  ;;  %v109_v38 = vld [vmem:[%s1548_s1 + $0x130] sm:$0xff]  ;;  %v957_v39 = vadd.f32 -1.0, %v110_v37 }
  0x30   :  { %274 = vperm.xlu1 %1089, %v941_v5   ;;  %269 = vperm.xlu0 %1088, %v940_v6   ;;  %v956_v40 = vadd.f32 -1.0, %v109_v38  ;;  %v1417_v5 = vld [vmem:[%s1549_s2] ss:$0 sm:$0xff]  ;;  %s1137_s2 = smov [#allocation2]  }
  0x32   :  { %1053 = vmatmul.mubr.msk.bf16.gmra.mxu0 %vm568_vm0, %v1112_v11  ;;  %1073 = vmatmul.mubr.msk.bf16.gmra.mxu1 %vm568_vm0, %v1113_v12  ;;  %v1428_v11 = vld [vmem:[%s1551_s4] ss:$0 sm:$0xff]  ;;  %s907_s4 = sshll.u32 %s1137_s2, 4  ;;  %s908_s4 = int_to_ptr.vmem [resolvable:$true] %s907_s4 }
  0x33   :  { %s1114_s19 = scalar_lea.vmem %s908_s4, 5120  ;;  %p1119_p1 = scmp.lt.s32.totalorder %s908_s4, %s908_s4 }
  0x34   :  { %284 = vperm.xlu1 %1089, %v943_v9   ;;  %279 = vperm.xlu0 %1088, %v942_v10   ;;  %p1115_p0 = scmp.ne.s32.totalorder %s908_s4, %s1114_s19  ;;  %p1120_p2 = scmp.lt.s32.totalorder %s1114_s19, %s1114_s19 }
  0x36   :  { %p1121_p3 = por %p1120_p2, %p1119_p1 }
  0x38   :  { %294 = vperm.xlu1 %1089, %v945_v15   ;;  %289 = vperm.xlu0 %1088, %v944_v16   ;;  %p1122_p4 = pnand %p1121_p3, %p1115_p0 }
  0x3c   :  { %304 = vperm.xlu1 %1089, %v947_v19   ;;  %299 = vperm.xlu0 %1088, %v946_v20  }
  0x40   :  { %314 = vperm.xlu1 %1089, %v949_v23   ;;  %309 = vperm.xlu0 %1088, %v948_v24  }
  0x44   :  { %324 = vperm.xlu1 %1089, %v951_v27   ;;  %319 = vperm.xlu0 %1088, %v950_v28  }
  0x48   :  { %334 = vperm.xlu1 %1089, %v953_v31   ;;  %329 = vperm.xlu0 %1088, %v952_v32  }
  0x4c   :  { %344 = vperm.xlu1 %1089, %v955_v35   ;;  %339 = vperm.xlu0 %1088, %v954_v36  }
  0x50   :  { %354 = vperm.xlu1 %1089, %v957_v39   ;;  %349 = vperm.xlu0 %1088, %v956_v40  }
  0x7f   :  { %v160_v41 = vpop.permute.xlu0 %159  ;;  %v170_v42 = vpop.permute.xlu1 %169 }
  0x80   :  { %v359_v7 = vmul.f32 %v1417_v5, %v170_v42  ;;  %v357_v9 = vmul.f32 %v1417_v5, %v160_v41 }
  0x82   :  { %v399_v17 = vadd.f32 1.0, %v359_v7  ;;  %v397_v22 = vadd.f32 1.0, %v357_v9 }
  0x83   :  { %v165_v43 = vpop.permute.xlu0 %164  ;;  %v175_v44 = vpop.permute.xlu1 %174 }
  0x84   :  { %v360_v13 = vmul.f32 %v1417_v5, %v175_v44  ;;  %v358_v23 = vmul.f32 %v1417_v5, %v165_v43 }
  0x86   :  { %v400_v32 = vadd.f32 1.0, %v360_v13  ;;  %v398_v43 = vadd.f32 1.0, %v358_v23 }
  0x87   :  { %v1382_v45 = vpop.permute.xlu0 %179  ;;  %v1384_v46 = vpop.permute.xlu1 %184 }
  0x88   :  { %v361_v44 = vmul.f32 %v1417_v5, %v1382_v45 }
  0x8b   :  { %v190_v47 = vpop.permute.xlu0 %189  ;;  %v1386_v48 = vpop.permute.xlu1 %194 }
  0x8c   :  { %v363_v33 = vmul.f32 %v1417_v5, %v190_v47 }
  0x8e   :  { %v403_v13 = vadd.f32 1.0, %v363_v33 }
  0x8f   :  { %v1388_v49 = vpop.permute.xlu0 %199  ;;  %v1390_v50 = vpop.permute.xlu1 %204 }
  0x93   :  { %v1392_v51 = vpop.permute.xlu0 %209  ;;  %v1394_v52 = vpop.permute.xlu1 %214 }
  0x97   :  { %v1396_v53 = vpop.permute.xlu0 %219  ;;  %v1398_v54 = vpop.permute.xlu1 %224 }
  0x9b   :  { %v1400_v55 = vpop.permute.xlu0 %229  ;;  %v1402_v56 = vpop.permute.xlu1 %234 }
  0x9f   :  { %v1404_v57 = vpop.permute.xlu0 %239  ;;  %v1406_v58 = vpop.permute.xlu1 %244 }
  0xa3   :  { %v1408_v59 = vpop.permute.xlu0 %249  ;;  %v1410_v60 = vpop.permute.xlu1 %254 }
  0xa7   :  { %v260_v61 = vpop.permute.xlu0 %259  ;;  %v265_v62 = vpop.permute.xlu1 %264 }
  0xa8   :  { %v377_v10 = vmul.f32 %v1417_v5, %v260_v61  ;;  %v378_v24 = vmul.f32 %v1417_v5, %v265_v62 }
  0xaa   :  { %v417_v25 = vadd.f32 1.0, %v377_v10  ;;  %v418_v47 = vadd.f32 1.0, %v378_v24  ;;  %v364_v10 = vmul.f32 %v1417_v5, %v1386_v48 }
  0xab   :  { %v270_v63 = vpop.permute.xlu0 %269  ;;  %v275_v0 = vpop.permute.xlu1 %274 }
  0xac   :  { %v379_v8 = vmul.f32 %v1417_v5, %v270_v63  ;;  %v380_v14 = vmul.f32 %v1417_v5, %v275_v0 }
  0xae   :  { %v419_v18 = vadd.f32 1.0, %v379_v8  ;;  %v420_v34 = vadd.f32 1.0, %v380_v14 }
  0xaf   :  { %v280_v1 = vpop.permute.xlu0 %279  ;;  %v1412_v2 = vpop.permute.xlu1 %284 }
  0xb0   :  { %v381_v61 = vmul.f32 %v1417_v5, %v280_v1  ;;  %v382_v48 = vmul.f32 %v1417_v5, %v1412_v2 }
  0xb2   :  { %v421_v23 = vadd.f32 1.0, %v381_v61 }
  0xb3   :  { %v290_v3 = vpop.permute.xlu0 %289  ;;  %v295_v4 = vpop.permute.xlu1 %294 }
  0xb4   :  { %v383_v35 = vmul.f32 %v1417_v5, %v290_v3  ;;  %v384_v45 = vmul.f32 %v1417_v5, %v295_v4 }
  0xb6   :  { %v423_v14 = vadd.f32 1.0, %v383_v35 }
  0xb7   :  { %v1419_v6 = vpop.permute.xlu0 %299  ;;  %v1430_v12 = vpop.permute.xlu1 %304 }
  0xbb   :  { %v1434_v19 = vpop.permute.xlu0 %309  ;;  %v1444_v38 = vpop.permute.xlu1 %314 }
  0xbc   :  { %v387_v2 = vmul.f32 %v1417_v5, %v1434_v19 }
  0xbf   :  { %v1451_v0 = vpop.permute.xlu0 %319 }
  0xd2   :  { %v1038_v15 = vpop.f32.mrf.mxu0  ;;  %v1058_v16 = vpop.f32.mrf.mxu1 }
  0xd3   :  { %v672_v20 = vadd.f32 %v1038_v15, %v1428_v11  ;;  %v752_v21 = vadd.f32 %v1058_v16, %v1428_v11 }
  0xd4   :  { %v663_v26 = vpop.f32.mrf.mxu0  ;;  %v743_v27 = vpop.f32.mrf.mxu1 }
  0xd5   :  { %v824_v28 = vmul.f32 %v672_v20, %v399_v17  ;;  %v844_v29 = vmul.f32 %v752_v21, %v419_v18  ;;  %v664_v30 = vadd.f32 %v1428_v11, %v663_v26  ;;  %v744_v31 = vadd.f32 %v1428_v11, %v743_v27 }
  0xd6   :  { %v1039_v36 = vpop.f32.mrf.mxu0  ;;  %v1059_v37 = vpop.f32.mrf.mxu1  ;;  %v362_v21 = vmul.f32 %v1417_v5, %v1384_v46  ;;  %v367_v46 = vmul.f32 %v1417_v5, %v1392_v51  ;;  %v422_v51 = vadd.f32 1.0, %v382_v48 }
  0xd7   :  { %864 = vst [vmem:[#allocation2 + $0x10] sm:$0xff] %v824_v28  ;;  %884 = vst [vmem:[#allocation2 + $0xb0] sm:$0xff] %v844_v29  ;;  %v822_v39 = vmul.f32 %v664_v30, %v397_v22  ;;  %v842_v40 = vmul.f32 %v744_v31, %v417_v25  ;;  %v675_v41 = vadd.f32 %v1039_v36, %v1428_v11  ;;  %v401_v22 = vadd.f32 1.0, %v361_v44  ;;  %v1464_v25 = vpop.permute.xlu1 %324 }
  0xd8   :  { %v755_v42 = vadd.f32 %v1059_v37, %v1428_v11  ;;  %v666_v62 = vpop.f32.mrf.mxu0  ;;  %v746_v63 = vpop.f32.mrf.mxu1  ;;  %v404_v30 = vadd.f32 1.0, %v364_v10  ;;  %v424_v31 = vadd.f32 1.0, %v384_v45 }
  0xd9   :  { %862 = vst [vmem:[#allocation2] sm:$0xff] %v822_v39  ;;  %882 = vst [vmem:[#allocation2 + $0xa0] sm:$0xff] %v842_v40  ;;  %v825_v3 = vmul.f32 %v675_v41, %v400_v32  ;;  %v667_v8 = vadd.f32 %v1428_v11, %v666_v62  ;;  %v747_v9 = vadd.f32 %v1428_v11, %v746_v63  ;;  %v402_v40 = vadd.f32 1.0, %v362_v21 }
  0xda   :  { %v845_v7 = vmul.f32 %v755_v42, %v420_v34  ;;  %v1042_v1 = vpop.f32.mrf.mxu0  ;;  %v1062_v15 = vpop.f32.mrf.mxu1  ;;  %v365_v41 = vmul.f32 %v1417_v5, %v1388_v49  ;;  %v385_v42 = vmul.f32 %v1417_v5, %v1419_v6  ;;  %v368_v63 = vmul.f32 %v1417_v5, %v1394_v52 }
  0xdb   :  { %865 = vst [vmem:[#allocation2 + $0x18] sm:$0xff] %v825_v3  ;;  %v823_v16 = vmul.f32 %v667_v8, %v398_v43  ;;  %v843_v17 = vmul.f32 %v747_v9, %v418_v47  ;;  %v688_v18 = vadd.f32 %v1042_v1, %v1428_v11  ;;  %v768_v20 = vadd.f32 %v1062_v15, %v1428_v11  ;;  %v330_v34 = vpop.permute.xlu0 %329  ;;  %v335_v9 = vpop.permute.xlu1 %334 }
  0xdc   :  { %885 = vst [vmem:[#allocation2 + $0xb8] sm:$0xff] %v845_v7  ;;  %v679_v4 = vpop.f32.mrf.mxu0  ;;  %v759_v24 = vpop.f32.mrf.mxu1  ;;  %v407_v3 = vadd.f32 1.0, %v367_v46  ;;  %v388_v49 = vmul.f32 %v1417_v5, %v1444_v38  ;;  %v427_v7 = vadd.f32 1.0, %v387_v2  ;;  %v366_v1 = vmul.f32 %v1417_v5, %v1390_v50 }
  0xdd   :  { %863 = vst [vmem:[#allocation2 + $0x8] sm:$0xff] %v823_v16  ;;  %883 = vst [vmem:[#allocation2 + $0xa8] sm:$0xff] %v843_v17  ;;  %v828_v26 = vmul.f32 %v688_v18, %v403_v13  ;;  %v848_v27 = vmul.f32 %v768_v20, %v423_v14  ;;  %v680_v28 = vadd.f32 %v1428_v11, %v679_v4  ;;  %v405_v52 = vadd.f32 1.0, %v365_v41 }
  0xde   :  { %v760_v29 = vadd.f32 %v1428_v11, %v759_v24  ;;  %v1043_v32 = vpop.f32.mrf.mxu0  ;;  %v1063_v33 = vpop.f32.mrf.mxu1  ;;  %v386_v15 = vmul.f32 %v1417_v5, %v1430_v12  ;;  %v425_v38 = vadd.f32 1.0, %v385_v42  ;;  %v371_v50 = vmul.f32 %v1417_v5, %v1400_v55 }
  0xdf   :  { %868 = vst [vmem:[#allocation2 + $0x30] sm:$0xff] %v828_v26  ;;  %888 = vst [vmem:[#allocation2 + $0xd0] sm:$0xff] %v848_v27  ;;  %v826_v35 = vmul.f32 %v680_v28, %v401_v22  ;;  %v691_v37 = vadd.f32 %v1043_v32, %v1428_v11  ;;  %v771_v39 = vadd.f32 %v1063_v33, %v1428_v11  ;;  %v1490_v18 = vpop.permute.xlu0 %339  ;;  %v428_v4 = vadd.f32 1.0, %v388_v49 }
  0xe0   :  { %v846_v36 = vmul.f32 %v760_v29, %v421_v23  ;;  %v682_v19 = vpop.f32.mrf.mxu0  ;;  %v762_v43 = vpop.f32.mrf.mxu1  ;;  %v408_v23 = vadd.f32 1.0, %v368_v63  ;;  %v391_v12 = vmul.f32 %v1417_v5, %v330_v34  ;;  %v406_v46 = vadd.f32 1.0, %v366_v1 }
  0xe1   :  { %866 = vst [vmem:[#allocation2 + $0x20] sm:$0xff] %v826_v35  ;;  %v829_v44 = vmul.f32 %v691_v37, %v404_v30  ;;  %v849_v47 = vmul.f32 %v771_v39, %v424_v31  ;;  %v683_v61 = vadd.f32 %v1428_v11, %v682_v19  ;;  %v763_v62 = vadd.f32 %v1428_v11, %v762_v43  ;;  %v1503_v34 = vpop.permute.xlu1 %344 }
  0xe2   :  { %886 = vst [vmem:[#allocation2 + $0xc0] sm:$0xff] %v846_v36  ;;  %v1046_v8 = vpop.f32.mrf.mxu0  ;;  %v1066_v6 = vpop.f32.mrf.mxu1  ;;  %v369_v31 = vmul.f32 %v1417_v5, %v1396_v53  ;;  %v426_v2 = vadd.f32 1.0, %v386_v15  ;;  %v389_v55 = vmul.f32 %v1417_v5, %v1451_v0  ;;  %v411_v53 = vadd.f32 1.0, %v371_v50 }
  0xe3   :  { %869 = vst [vmem:[#allocation2 + $0x38] sm:$0xff] %v829_v44  ;;  %889 = vst [vmem:[#allocation2 + $0xd8] sm:$0xff] %v849_v47  ;;  %v827_v10 = vmul.f32 %v683_v61, %v402_v40  ;;  %v847_v13 = vmul.f32 %v763_v62, %v422_v51  ;;  %v704_v45 = vadd.f32 %v1046_v8, %v1428_v11  ;;  %v431_v51 = vadd.f32 1.0, %v391_v12  ;;  %v350_v19 = vpop.permute.xlu0 %349 }
  0xe4   :  { %v784_v14 = vadd.f32 %v1066_v6, %v1428_v11  ;;  %v695_v16 = vpop.f32.mrf.mxu0  ;;  %v775_v17 = vpop.f32.mrf.mxu1  ;;  %v372_v40 = vmul.f32 %v1417_v5, %v1402_v56  ;;  %v392_v41 = vmul.f32 %v1417_v5, %v335_v9  ;;  %v370_v62 = vmul.f32 %v1417_v5, %v1398_v54 }
  0xe5   :  { %867 = vst [vmem:[#allocation2 + $0x28] sm:$0xff] %v827_v10  ;;  %887 = vst [vmem:[#allocation2 + $0xc8] sm:$0xff] %v847_v13  ;;  %v832_v20 = vmul.f32 %v704_v45, %v407_v3  ;;  %v696_v22 = vadd.f32 %v1428_v11, %v695_v16  ;;  %v776_v48 = vadd.f32 %v1428_v11, %v775_v17  ;;  %v409_v63 = vadd.f32 1.0, %v369_v31 }
  0xe6   :  { %v852_v21 = vmul.f32 %v784_v14, %v427_v7  ;;  %v1047_v24 = vpop.f32.mrf.mxu0  ;;  %v1067_v26 = vpop.f32.mrf.mxu1  ;;  %v390_v56 = vmul.f32 %v1417_v5, %v1464_v25  ;;  %v429_v3 = vadd.f32 1.0, %v389_v55  ;;  %v412_v13 = vadd.f32 1.0, %v372_v40 }
  0xe7   :  { %872 = vst [vmem:[#allocation2 + $0x50] sm:$0xff] %v832_v20  ;;  %v830_v27 = vmul.f32 %v696_v22, %v405_v52  ;;  %v850_v28 = vmul.f32 %v776_v48, %v425_v38  ;;  %v707_v29 = vadd.f32 %v1047_v24, %v1428_v11  ;;  %v787_v30 = vadd.f32 %v1067_v26, %v1428_v11  ;;  %v355_v52 = vpop.permute.xlu1 %354 }
  0xe8   :  { %892 = vst [vmem:[#allocation2 + $0xf0] sm:$0xff] %v852_v21  ;;  %v698_v32 = vpop.f32.mrf.mxu0  ;;  %v778_v33 = vpop.f32.mrf.mxu1  ;;  %v375_v45 = vmul.f32 %v1417_v5, %v1408_v59  ;;  %v432_v54 = vadd.f32 1.0, %v392_v41  ;;  %v395_v14 = vmul.f32 %v1417_v5, %v350_v19  ;;  %v410_v20 = vadd.f32 1.0, %v370_v62 }
  0xe9   :  { %870 = vst [vmem:[#allocation2 + $0x40] sm:$0xff] %v830_v27  ;;  %890 = vst [vmem:[#allocation2 + $0xe0] sm:$0xff] %v850_v28  ;;  %v833_v35 = vmul.f32 %v707_v29, %v408_v23  ;;  %v853_v36 = vmul.f32 %v787_v30, %v428_v4  ;;  %v699_v37 = vadd.f32 %v1428_v11, %v698_v32  ;;  %v430_v22 = vadd.f32 1.0, %v390_v56 }
  0xea   :  { %v779_v39 = vadd.f32 %v1428_v11, %v778_v33  ;;  %v1050_v0 = vpop.f32.mrf.mxu0  ;;  %v1070_v42 = vpop.f32.mrf.mxu1  ;;  %v373_v21 = vmul.f32 %v1417_v5, %v1404_v57  ;;  %v393_v59 = vmul.f32 %v1417_v5, %v1490_v18  ;;  %v376_v26 = vmul.f32 %v1417_v5, %v1410_v60 }
  0xeb   :  { %873 = vst [vmem:[#allocation2 + $0x58] sm:$0xff] %v833_v35  ;;  %893 = vst [vmem:[#allocation2 + $0xf8] sm:$0xff] %v853_v36  ;;  %v831_v43 = vmul.f32 %v699_v37, %v406_v46  ;;  %v720_v47 = vadd.f32 %v1050_v0, %v1428_v11  ;;  %v800_v61 = vadd.f32 %v1070_v42, %v1428_v11  ;;  %v415_v27 = vadd.f32 1.0, %v375_v45 }
  0xec   :  { %v851_v44 = vmul.f32 %v779_v39, %v426_v2  ;;  %v711_v49 = vpop.f32.mrf.mxu0  ;;  %v791_v7 = vpop.f32.mrf.mxu1  ;;  %v396_v57 = vmul.f32 %v1417_v5, %v355_v52  ;;  %v435_v28 = vadd.f32 1.0, %v395_v14  ;;  %v374_v55 = vmul.f32 %v1417_v5, %v1406_v58 }
  0xed   :  { %871 = vst [vmem:[#allocation2 + $0x48] sm:$0xff] %v831_v43  ;;  %v836_v8 = vmul.f32 %v720_v47, %v411_v53  ;;  %v856_v6 = vmul.f32 %v800_v61, %v431_v51  ;;  %v712_v9 = vadd.f32 %v1428_v11, %v711_v49  ;;  %v792_v10 = vadd.f32 %v1428_v11, %v791_v7 }
  0xee   :  { %891 = vst [vmem:[#allocation2 + $0xe8] sm:$0xff] %v851_v44  ;;  %v1051_v1 = vpop.f32.mrf.mxu0  ;;  %v1071_v25 = vpop.f32.mrf.mxu1  ;;  %v413_v32 = vadd.f32 1.0, %v373_v21  ;;  %v394_v60 = vmul.f32 %v1417_v5, %v1503_v34  ;;  %v433_v33 = vadd.f32 1.0, %v393_v59  ;;  %v416_v41 = vadd.f32 1.0, %v376_v26 }
  0xef   :  { %876 = vst [vmem:[#allocation2 + $0x70] sm:$0xff] %v836_v8  ;;  %896 = vst [vmem:[#allocation2 + $0x110] sm:$0xff] %v856_v6  ;;  %v834_v15 = vmul.f32 %v712_v9, %v409_v63  ;;  %v854_v38 = vmul.f32 %v792_v10, %v429_v3  ;;  %v723_v16 = vadd.f32 %v1051_v1, %v1428_v11  ;;  %v436_v51 = vadd.f32 1.0, %v396_v57 }
  0xf0   :  { %v803_v17 = vadd.f32 %v1071_v25, %v1428_v11  ;;  %v714_v48 = vpop.f32.mrf.mxu0  ;;  %v794_v23 = vpop.f32.mrf.mxu1  ;;  %v414_v43 = vadd.f32 1.0, %v374_v55  ;;  %v434_v44 = vadd.f32 1.0, %v394_v60 }
  0xf1   :  { %874 = vst [vmem:[#allocation2 + $0x60] sm:$0xff] %v834_v15  ;;  %894 = vst [vmem:[#allocation2 + $0x100] sm:$0xff] %v854_v38  ;;  %v837_v50 = vmul.f32 %v723_v16, %v412_v13  ;;  %v715_v12 = vadd.f32 %v1428_v11, %v714_v48  ;;  %v795_v24 = vadd.f32 %v1428_v11, %v794_v23 }
  0xf2   :  { %v857_v4 = vmul.f32 %v803_v17, %v432_v54  ;;  %v1054_v29 = vpop.f32.mrf.mxu0  ;;  %v1074_v30 = vpop.f32.mrf.mxu1 }
  0xf3   :  { %877 = vst [vmem:[#allocation2 + $0x78] sm:$0xff] %v837_v50  ;;  %v835_v18 = vmul.f32 %v715_v12, %v410_v20  ;;  %v855_v46 = vmul.f32 %v795_v24, %v430_v22  ;;  %v736_v31 = vadd.f32 %v1054_v29, %v1428_v11  ;;  %v816_v2 = vadd.f32 %v1074_v30, %v1428_v11 }
  0xf4   :  { %897 = vst [vmem:[#allocation2 + $0x118] sm:$0xff] %v857_v4  ;;  %v727_v35 = vpop.f32.mrf.mxu0  ;;  %v807_v36 = vpop.f32.mrf.mxu1 }
  0xf5   :  { %875 = vst [vmem:[#allocation2 + $0x68] sm:$0xff] %v835_v18  ;;  %895 = vst [vmem:[#allocation2 + $0x108] sm:$0xff] %v855_v46  ;;  %v840_v37 = vmul.f32 %v736_v31, %v415_v27  ;;  %v860_v39 = vmul.f32 %v816_v2, %v435_v28  ;;  %v728_v40 = vadd.f32 %v1428_v11, %v727_v35 }
  0xf6   :  { %v808_v53 = vadd.f32 %v1428_v11, %v807_v36  ;;  %v1055_v0 = vpop.f32.mrf.mxu0  ;;  %v1075_v42 = vpop.f32.mrf.mxu1 }
  0xf7   :  { %880 = vst [vmem:[#allocation2 + $0x90] sm:$0xff] %v840_v37  ;;  %900 = vst [vmem:[#allocation2 + $0x130] sm:$0xff] %v860_v39  ;;  %v838_v58 = vmul.f32 %v728_v40, %v413_v32  ;;  %v739_v5 = vadd.f32 %v1055_v0, %v1428_v11  ;;  %v819_v34 = vadd.f32 %v1075_v42, %v1428_v11 }
  0xf8   :  { %v858_v19 = vmul.f32 %v808_v53, %v433_v33  ;;  %v730_v47 = vpop.f32.mrf.mxu0  ;;  %v810_v61 = vpop.f32.mrf.mxu1 }
  0xf9   :  { %878 = vst [vmem:[#allocation2 + $0x80] sm:$0xff] %v838_v58  ;;  %v841_v62 = vmul.f32 %v739_v5, %v416_v41  ;;  %v861_v63 = vmul.f32 %v819_v34, %v436_v51  ;;  %v731_v56 = vadd.f32 %v1428_v11, %v730_v47  ;;  %v811_v3 = vadd.f32 %v1428_v11, %v810_v61 }
  0xfa   :  { %898 = vst [vmem:[#allocation2 + $0x120] sm:$0xff] %v858_v19 }
  0xfb   :  { %881 = vst [vmem:[#allocation2 + $0x98] sm:$0xff] %v841_v62  ;;  %901 = vst [vmem:[#allocation2 + $0x138] sm:$0xff] %v861_v63  ;;  %v839_v49 = vmul.f32 %v731_v56, %v414_v43  ;;  %v859_v7 = vmul.f32 %v811_v3, %v434_v44 }
  0xfd   :  { %879 = vst [vmem:[#allocation2 + $0x88] sm:$0xff] %v839_v49  ;;  %899 = vst [vmem:[#allocation2 + $0x128] sm:$0xff] %v859_v7 }
  0xfe   :  { %1125 = shalt.err (!%p1122_p4)
}
  0xff   :  { %s1138_s20 = smov 128   ;;  %s1139_s0 = smov 8  }
 0x100   :  { %913 = dma.vmem_to_hbm [thread:$0]  %s908_s4, 5120, %s1552_s5, [#allocation3], %s1138_s20, %s1138_s20, %s1139_s0  }
 0x101   :  { %1134 = dma.done.wait [#allocation3], 5120  }
 0x102   :  { %1135 = vsyncadd [#allocation3], 4294962176 }
 0x103   :  { %917 = vsyncpa [#allocation3], 1 }

</bundles_post_ra>
